<compile_context>
chip_gen: v6e
topology: v6e:2x2x1
jax: 0.10.0
libtpu: 0.0.40
codegen_flags: <defaults>
</compile_context>

<pallas_src>
import math

import numpy as np
import jax
import jax.numpy as jnp
from jax.experimental import pallas as pl
from jax.experimental.pallas import tpu as pltpu

_LANE = 128
_MAX_BLOCK_BYTES = 8 * 1024 * 1024        # above this per block, bail out to XLA
_VMEM_LIMIT_BYTES = 32 * 1024 * 1024      # safe scoped limit on v5e/v6e/v7x
_SMALL_FALLBACK_ELEMS = 1 << 18           # ~256K elems: below this XLA's fused add wins


def _device_kind() -> str:
    try:
        return jax.devices()[0].device_kind.lower()
    except Exception:  # pragma: no cover - defensive (e.g. no devices yet)
        return ""


_KIND = _device_kind()
_IS_V7X = ("v7" in _KIND) or ("7x" in _KIND)
# 2 MiB blocks on 64-MiB-VMEM v7x; 4 MiB on 128-MiB v5e/v6e (fewer grid steps).
_TARGET_BLOCK_BYTES = (2 if _IS_V7X else 4) * 1024 * 1024


def _dim_semantics(n_axes: int):
    """Grid semantics: leading axis CORE_PARALLEL on v7x (2 TCs/chip), else parallel."""
    if _IS_V7X and hasattr(pltpu, "CORE_PARALLEL"):
        rest = getattr(pltpu, "PARALLEL", "parallel")
        return (pltpu.CORE_PARALLEL,) + (rest,) * (n_axes - 1)
    return ("parallel",) * n_axes


def _sinusoid_table(n_position: int, d_hid: int) -> np.ndarray:
    """Exact reimplementation of the PyTorch _get_sinusoid_encoding_table."""
    pos = np.arange(n_position, dtype=np.float64)[:, None]          # (P, 1)
    hid = np.arange(d_hid, dtype=np.float64)[None, :]                # (1, D)
    angle = pos / np.power(10000.0, 2.0 * (hid // 2) / d_hid)        # (P, D)
    table = np.array(angle)
    table[:, 0::2] = np.sin(table[:, 0::2])
    table[:, 1::2] = np.cos(table[:, 1::2])
    return table.astype(np.float32)                                  # (P, D)


def _pe_add_kernel(x_ref, pos_ref, o_ref):
    # Pure VPU add. Row path: both tiles are (TR, D') -> no broadcast.
    # Column fallback: pos is (1, TC) and broadcasts over sublanes only.
    o_ref[...] = x_ref[...] + pos_ref[...]


def _cost(x, pos):
    itemsize = x.dtype.itemsize
    return pl.CostEstimate(
        flops=int(x.size),
        transcendentals=0,
        bytes_accessed=int((2 * x.size + pos.size) * itemsize),
    )


def _sublane_unit(dtype) -> int:
    # One vreg packs (8,128) f32, (16,128) bf16, (32,128) int8/fp8.
    return max(8, 32 // jnp.dtype(dtype).itemsize)


def _pick_tile(total: int, unit: int, target: int) -> int:
    """Tile size along one axis: whole extent if it fits the budget (always a
    legal block dim), otherwise the largest multiple of `unit` <= target."""
    if total <= max(unit, target):
        return total
    return max(unit, (target // unit) * unit)


def _pe_rows(x, pos, *, donate_x=False):
    """Row-tiled lane-dense path: x (B, S, D) with D % 128 == 0, pos (S, D)."""
    B, S, D = x.shape
    itemsize = x.dtype.itemsize
    unit = _sublane_unit(x.dtype)
    target_rows = max(unit, _TARGET_BLOCK_BYTES // (D * itemsize))
    tr = _pick_tile(S, unit, target_rows)
    if tr * D * itemsize > _MAX_BLOCK_BYTES:
        # A single sublane-unit row tile already blows the block budget
        # (enormous D); let XLA fuse the add instead.
        return x + pos[None, :, :]
    # Batch is the innermost grid axis: the pos tile's block index is constant
    # across it, so pos is only re-fetched when the sequence tile changes.
    grid = (pl.cdiv(S, tr), B)
    return pl.pallas_call(
        _pe_add_kernel,
        out_shape=jax.ShapeDtypeStruct((B, S, D), x.dtype),
        grid_spec=pltpu.PrefetchScalarGridSpec(
            num_scalar_prefetch=0,
            grid=grid,
            in_specs=[
                pl.BlockSpec((None, tr, D), lambda s, b: (b, s, 0)),  # x: batch squeezed
                pl.BlockSpec((tr, D), lambda s, b: (s, 0)),           # pos tile matches x tile
            ],
            out_specs=pl.BlockSpec((None, tr, D), lambda s, b: (b, s, 0)),
        ),
        compiler_params=pltpu.CompilerParams(
            dimension_semantics=_dim_semantics(2),
            vmem_limit_bytes=_VMEM_LIMIT_BYTES,
        ),
        cost_estimate=_cost(x, pos),
        input_output_aliases={0: 0} if donate_x else {},
    )(x, pos)


def _pe_cols(x, pos):
    """Fallback when the lane fold is impossible (S not a multiple of the fold):
    flatten (B, S, D) -> (B, S*D) so stores are lane-dense, tile lanes with a
    cdiv grid (edge block masked)."""
    B, S, D = x.shape
    L = S * D
    itemsize = x.dtype.itemsize
    if B * min(L, _LANE) * itemsize > _MAX_BLOCK_BYTES:
        # Even one lane-width block exceeds the budget (huge B); let XLA fuse.
        return x + pos[None, :, :]
    x2 = x.reshape(B, L)
    pos2 = pos.reshape(1, L)
    target_cols = max(_LANE, _TARGET_BLOCK_BYTES // max(1, B * itemsize))
    tc = _pick_tile(L, _LANE, target_cols)
    grid = (pl.cdiv(L, tc),)
    out2 = pl.pallas_call(
        _pe_add_kernel,
        out_shape=jax.ShapeDtypeStruct((B, L), x.dtype),
        grid_spec=pltpu.PrefetchScalarGridSpec(
            num_scalar_prefetch=0,
            grid=grid,
            in_specs=[
                pl.BlockSpec((B, tc), lambda j: (0, j)),
                pl.BlockSpec((1, tc), lambda j: (0, j)),
            ],
            out_specs=pl.BlockSpec((B, tc), lambda j: (0, j)),
        ),
        compiler_params=pltpu.CompilerParams(
            dimension_semantics=_dim_semantics(1),
            vmem_limit_bytes=_VMEM_LIMIT_BYTES,
        ),
        cost_estimate=_cost(x, pos),
    )(x2, pos2)
    return out2.reshape(B, S, D)


def _positional_encoding_prepared(xp, pos, *, force_pallas=False, donate_x=False):
    """xp: (B, S, D) already in the output dtype; pos: (S, D) in the same dtype."""
    B, S, D = xp.shape
    if (not force_pallas) and xp.size <= _SMALL_FALLBACK_ELEMS:
        # Launch + pipeline-warmup overhead dwarfs data movement for small
        # inputs, and XLA can fuse the add into neighbouring ops.
        return xp + pos[None, :, :]
    if D % _LANE == 0:
        return _pe_rows(xp, pos, donate_x=donate_x)
    # Fold consecutive sequence positions into the lane dimension so the last
    # (lane) dim becomes a multiple of 128:  (B, S, D) -> (B, S//k, k*D).
    k = _LANE // math.gcd(D, _LANE)
    if S % k == 0:
        xf = xp.reshape(B, S // k, k * D)
        posf = pos.reshape(S // k, k * D)
        # NOTE: no input/output aliasing here -- the reshape is a distinct view.
        return _pe_rows(xf, posf).reshape(B, S, D)
    return _pe_cols(xp, pos)


def positional_encoding(x: jax.Array, pos_table: jax.Array, *,
                        force_pallas: bool = False,
                        donate_x: bool = False) -> jax.Array:
    """Functional form. x: (B, S, D); pos_table: (n_position, D).

    Returns x + pos_table[:S] with torch-style dtype promotion.
    `donate_x` only aliases x->out on the direct lane-dense path and only takes
    effect under jit with proper donation; the caller's x is clobbered then.
    """
    _, S, _ = x.shape
    out_dtype = jnp.promote_types(x.dtype, pos_table.dtype)
    pos = pos_table[:S, :].astype(out_dtype)
    return _positional_encoding_prepared(x.astype(out_dtype), pos,
                                         force_pallas=force_pallas,
                                         donate_x=donate_x)


class PositionalEncoding:
    """JAX/Pallas mirror of the PyTorch module.

    Caches the pos_table[:S].astype(dtype) slice per (S, dtype) so repeated
    forwards don't launch an extra XLA slice/convert before the Pallas add.
    """

    def __init__(self, d_hid: int, n_position: int = 200):
        self.pos_table = jnp.asarray(_sinusoid_table(n_position, d_hid))  # (P, D)
        self._cache = {}

    def __call__(self, x: jax.Array, *, force_pallas: bool = False) -> jax.Array:
        _, S, _ = x.shape
        out_dtype = jnp.promote_types(x.dtype, self.pos_table.dtype)
        key = (S, jnp.dtype(out_dtype).name)
        pos = self._cache.get(key)
        if pos is None:
            pos = self.pos_table[:S, :].astype(out_dtype)
            self._cache[key] = pos
        return _positional_encoding_prepared(x.astype(out_dtype), pos,
                                             force_pallas=force_pallas)


if __name__ == "__main__":
    n_position = 200
    key = jax.random.PRNGKey(0)
    k1, k2, k3 = jax.random.split(key, 3)

    # 1) Module-default small shape (B=2, S=8, D=32) through the class wrapper.
    #    force_pallas=True so the Pallas kernel is exercised even though the
    #    auto-dispatcher would hand a 2 KiB problem to XLA. Takes the
    #    fold-sequence-into-lanes path: (2, 8, 32) -> (2, 2, 128).
    d_hid, batch, seq = 32, 2, 8
    pe = PositionalEncoding(d_hid, n_position)
    x_small = jax.random.normal(k1, (batch, seq, d_hid), dtype=jnp.float32)
    out_small = jax.block_until_ready(pe(x_small, force_pallas=True))
    ref_small = x_small + pe.pos_table[None, :seq, :]
    np.testing.assert_allclose(np.asarray(out_small), np.asarray(ref_small),
                               rtol=1e-6, atol=1e-6)

    # 2) Lane-dense shape (D multiple of 128) exercising the direct row path.
    d_big, seq_big = 256, 64
    pos_table_big = jnp.asarray(_sinusoid_table(n_position, d_big))   # (200, 256)
    x_big = jax.random.normal(k2, (batch, seq_big, d_big), dtype=jnp.float32)
    out_big = jax.block_until_ready(
        positional_encoding(x_big, pos_table_big, force_pallas=True))
    ref_big = x_big + pos_table_big[None, :seq_big, :]
    np.testing.assert_allclose(np.asarray(out_big), np.asarray(ref_big),
                               rtol=1e-6, atol=1e-6)

    # 3) Ragged sequence (S=7 not a multiple of the fold factor 4) exercising
    #    the guarded column fallback path with a lane-tiled flattened view.
    seq_odd = 7
    pos_table_small = jnp.asarray(_sinusoid_table(n_position, d_hid))  # (200, 32)
    x_odd = jax.random.normal(k3, (batch, seq_odd, d_hid), dtype=jnp.float32)
    out_odd = jax.block_until_ready(
        positional_encoding(x_odd, pos_table_small, force_pallas=True))
    ref_odd = x_odd + pos_table_small[None, :seq_odd, :]
    np.testing.assert_allclose(np.asarray(out_odd), np.asarray(ref_odd),
                               rtol=1e-6, atol=1e-6)

    print("KERNEL_OK")
</pallas_src>

<mosaic_0001>
module attributes {stable_mosaic.version = 11 : i64} {
  func.func @_pe_add_kernel(%arg0: i32, %arg1: i32, %arg2: memref<1x2x128xf32, #tpu.memory_space<vmem>>, %arg3: memref<2x128xf32, #tpu.memory_space<vmem>>, %arg4: memref<1x2x128xf32, #tpu.memory_space<vmem>>) attributes {dimension_semantics = [#tpu.dimension_semantics<parallel>, #tpu.dimension_semantics<parallel>], iteration_bounds = array<i64: 1, 2>, scalar_prefetch = 0 : i64, scratch_operands = 0 : i64, tpu.core_type = #tpu.core_type<tc>, window_params = [{transform_indices = @transform_0, window_bounds = array<i64: 1, 2, 128>}, {transform_indices = @transform_1, window_bounds = array<i64: 2, 128>}, {transform_indices = @transform_2, window_bounds = array<i64: 1, 2, 128>}]} {
    %c0 = arith.constant 0 : index
    %c0_0 = arith.constant 0 : index
    %c0_1 = arith.constant 0 : index
    %0 = vector.load %arg2[%c0, %c0_0, %c0_1] : memref<1x2x128xf32, #tpu.memory_space<vmem>>, vector<1x2x128xf32>
    %1 = vector.shape_cast %0 : vector<1x2x128xf32> to vector<2x128xf32>
    %c0_2 = arith.constant 0 : index
    %c0_3 = arith.constant 0 : index
    %2 = vector.load %arg3[%c0_2, %c0_3] : memref<2x128xf32, #tpu.memory_space<vmem>>, vector<2x128xf32>
    %3 = arith.addf %1, %2 : vector<2x128xf32>
    %c0_4 = arith.constant 0 : index
    %c0_5 = arith.constant 0 : index
    %c0_6 = arith.constant 0 : index
    %4 = vector.load %arg4[%c0_4, %c0_5, %c0_6] : memref<1x2x128xf32, #tpu.memory_space<vmem>>, vector<1x2x128xf32>
    %5 = vector.shape_cast %4 : vector<1x2x128xf32> to vector<2x128xf32>
    %6 = vector.shape_cast %3 : vector<2x128xf32> to vector<1x2x128xf32>
    tpu.vector_store %arg4[%c0_4, %c0_5, %c0_6], %6 {strides = array<i32>} : memref<1x2x128xf32, #tpu.memory_space<vmem>>, vector<1x2x128xf32>,
    return
  }
  func.func @transform_0(%arg0: i32, %arg1: i32) -> (i32, i32, i32) {
    %c0_i32 = arith.constant 0 : i32
    %c0_i32_0 = arith.constant 0 : i32
    return %arg1, %arg0, %c0_i32 : i32, i32, i32
  }
  func.func @transform_1(%arg0: i32, %arg1: i32) -> (i32, i32) {
    %c0_i32 = arith.constant 0 : i32
    %c0_i32_0 = arith.constant 0 : i32
    return %arg0, %c0_i32 : i32, i32
  }
  func.func @transform_2(%arg0: i32, %arg1: i32) -> (i32, i32, i32) {
    %c0_i32 = arith.constant 0 : i32
    %c0_i32_0 = arith.constant 0 : i32
    return %arg1, %arg0, %c0_i32 : i32, i32, i32
  }
}

</mosaic_0001>

<bundles_post_ra>
// kernel: tpu_custom_call.1
= control target key start
LH: loop header
LB: loop body
LE: loop exit
PB: predicated region body
PF: predicated region fallthrough
CT: control target
= control target key end

     0   :  { %7 = vsyncpa [#allocation3], 0  ;;  %s714_s0 = inlined_call_operand.hbm [shape: f32[2,2,128], index: 0, kind: input, shape index: {}]   ;;  %s715_s1 = inlined_call_operand.hbm [shape: f32[2,128], index: 1, kind: input, shape index: {}]   ;;  %s716_s2 = inlined_call_operand.hbm [shape: f32[2,2,128], index: 2, kind: output, shape index: {}]  }
   0x1   :  { %9 = vsyncpa [#allocation3 + $0x1], 0 }
   0x2   :  { %10 = vsyncpa [#allocation6], 0 }
   0x3   :  { %11 = vsyncpa [#allocation4], 0 }
   0x4   :  { %13 = vsyncpa [#allocation4 + $0x1], 0  ;;  %s553_s9 = smov 0   ;;  %s555_s10 = smov 0  }
   0x5   :  { %s557_s11 = smov 0   ;;  %s559_s12 = smov 0  }
   0x6   :  { %s561_s13 = smov 0   ;;  %s563_s14 = smov 0  }
   0x7 LB: > { %s307_s15 = sadd.s32 4294967295, %s533_s14   ;;  %s308_s16 = sadd.s32 4294967294, %s533_s14   ;;  %s533_s14 = sphi %s563_s14, %s19_s14   ;;  %s529_s13 = sphi %s561_s13, %s733_s13   ;;  %s525_s12 = sphi %s559_s12, %s732_s12   ;;  %s521_s11 = sphi %s557_s11, %s731_s11   ;;  %s517_s10 = sphi %s555_s10, %s730_s10   ;;  %s513_s9 = sphi %s553_s9, %s729_s9  }
   0x8   : > { %p53_p0 = scmp.ne.s32.totalorder %s517_s10, %s513_s9  ;;  %p587_p1 = scmp.eq.s32.totalorder %s307_s15, 0 }
   0x9   : > { %p591_p2 = scmp.eq.s32.totalorder %s307_s15, 1  ;;  %p111_p3 = scmp.eq.s32.totalorder %s308_s16, 1 }
   0xa   : > { %p597_p4 = por %p587_p1, %p53_p0  ;;  %p309_p5 = scmp.ge.s32.totalorder %s533_s14, 1 }
   0xb   : > { %p602_p6 = por %p111_p3, %p53_p0  ;;  %p118_p7 = scmp.lt.s32.totalorder %s533_s14, 3 }
   0xc   : > { %s720_s19 = scalar_select %p597_p4, 1, 0 }
   0xd   : > { %s721_s20 = scalar_select %p602_p6, 1, 0 }
   0xe   : > { %p607_p8 = pnand %p309_p5, %p118_p7  ;;  %s535_s22 = smov [#allocation5]  }
   0xf   : > { %s133_s23 = sshll.u32 %s535_s22, 4  ;;  %s28_s25 = sadd.s32 1, %s529_s13  ;;  %s134_s23 = int_to_ptr.vmem [resolvable:$true] %s133_s23 }
  0x10   : > { %p330_p10 = pneg %p607_p8  ;;  %s40_s26 = sadd.s32 1, %s521_s11 }
  0x11   : > { %p29_p12 = scmp.ge.s32.totalorder %s28_s25, 2  ;;  %s406_s27 = scalar_lea.vmem %s134_s23, 32 }
  0x12   : > { %p616_p11 = pnand %p330_p10, %p587_p1  ;;  %p407_p0 = scmp.ne.s32.totalorder %s134_s23, %s406_s27 }
  0x13   : > { %p414_p7 = scmp.lt.s32.totalorder %s134_s23, %s134_s23  ;;  %p415_p6 = scmp.lt.s32.totalorder %s406_s27, %s406_s27 }
  0x14   : > { %p397_p13 = pneg %p616_p11 }
  0x15   : > { %p416_p9 = por %p415_p6, %p414_p7 }
  0x16   : > { %p409_p3 = pnand %p407_p0, %p397_p13 }
  0x18   : > { %p410_p5 = pneg %p409_p3 }
  0x1a   : > { %p417_p4 = pnand %p416_p9, %p410_p5 }
  0x1c   : > { %420 = shalt.err (!%p417_p4)
}
  0x1d   : > { %333 = dma.hbm_to_vmem [thread:$0]  (!%p616_p11), %s715_s1, 32, %s134_s23, [#allocation6]  }
  0x1e   : > { %s735_s25 = smov (%p29_p12, %s28_s25), 0  ;;  %p47_p6 = scmp.ne.s32.totalorder %s521_s11, %s517_s10 }
  0x1f   : > { %p48_p4 = scmp.eq.s32.totalorder %s533_s14, 0  ;;  %s35_s30 = ssub.s32 %s529_s13, %s735_s25 }
  0x20   : > { %p343_p9 = scmp.lt.s32.totalorder %s533_s14, 2  ;;  %p38_p10 = scmp.eq.s32.totalorder %s35_s30, 0 }
  0x21   : > { %p49_p13 = por %p48_p4, %p47_p6  ;;  %p639_p0 = por %p591_p2, %p47_p6 }
  0x22   : > { %s144_s4 = sand.u32 1, %s521_s11   ;;  %s313_s7 = sshll.u32 %s529_s13, 5 }
  0x23   : > { %s645_s5 = scalar_select %p38_p10, %s521_s11, %s40_s26  }
  0x24   : > { %s312_s6 = sshll.u32 %s144_s4, 1  ;;  %s154_s16 = scalar_lea.hbm %s714_s0, %s313_s7 }
  0x25   : > { %s148_s22 = scalar_lea.vmem [#allocation2], %s312_s6  ;;  %p651_p11 = pnand %p343_p9, %p49_p13 }
  0x26   : > { %s156_s23 = sshll.u32 %s148_s22, 4  ;;  %s145_s18 = scalar_lea.sflag [#allocation3], %s144_s4  ;;  %s157_s23 = int_to_ptr.vmem [resolvable:$true] %s156_s23 }
  0x27   : > { %p423_p2 = pneg %p651_p11  ;;  %s434_s27 = scalar_lea.vmem %s157_s23, 32 }
  0x28   : > { %p435_p12 = scmp.ne.s32.totalorder %s157_s23, %s434_s27  ;;  %s536_s26 = smov [#allocation2]  }
  0x29   : > { %s439_s28 = sshll.u32 %s536_s26, 4  ;;  %s440_s28 = int_to_ptr.vmem [resolvable:$false] %s439_s28 }
  0x2a   : > { %p437_p3 = pnand %p435_p12, %p423_p2  ;;  %s441_s29 = scalar_lea.vmem %s440_s28, 64 }
  0x2b   : > { %p442_p7 = scmp.lt.s32.totalorder %s157_s23, %s440_s28  ;;  %p443_p6 = scmp.lt.s32.totalorder %s441_s29, %s434_s27 }
  0x2c   : > { %p438_p5 = pneg %p437_p3 }
  0x2d   : > { %p444_p4 = por %p443_p6, %p442_p7 }
  0x2f   : > { %p445_p10 = pnand %p444_p4, %p438_p5 }
  0x31   : > { %448 = shalt.err (!%p445_p10)
}
  0x32   : > { %337 = dma.hbm_to_vmem [thread:$0]  (!%p651_p11), %s154_s16, 32, %s157_s23, %s145_s18  }
  0x33   : > { %165 = sbr.rel (%p607_p8) target bundleno = 83 (0x53), region = 28  ;;  %s662_s30 = sand.u32 (!%p607_p8), 1, %s517_s10  }
  0x34   : > { %s315_s4 = sshll.u32 (!%p607_p8), %s662_s30, 1  ;;  %s168_s6 = scalar_lea.sflag (!%p607_p8), [#allocation3], %s662_s30 }
  0x35   : > { %s171_s7 = scalar_lea.vmem (!%p607_p8), [#allocation2], %s315_s4  ;;  %p726_p9 = scmp.ne.s32.totalorder (!%p607_p8), %s720_s19, 0 }
  0x38   : > { %500 = dma.done.wait (%p726_p9), %s168_s6, 32  }
  0x39   : > { %502 = vsyncadd (%p726_p9), %s168_s6, 4294967264 }
  0x3a   : > { %504 = dma.done.wait (%p587_p1), [#allocation6], 32  }
  0x3b   : > { %506 = vsyncadd (%p587_p1), [#allocation6], 4294967264  ;;  %s195_s21 = scalar_lea.vmem [#allocation7], %s315_s4  ;;  %s319_s15 = sshll.u32 %s525_s12, 5  ;;  %v196_v0 = vld [vmem:[%s171_s7] sm:$0x3] }
  0x3c   : > { %s215_s8 = sshll.u32 %s195_s21, 4  ;;  %v197_v1 = vld [vmem:[#allocation5] sm:$0x3]  ;;  %s213_s19 = scalar_lea.hbm %s716_s2, %s319_s15  ;;  %s216_s8 = int_to_ptr.vmem [resolvable:$true] %s215_s8 }
  0x3d   : > { %v198_v2 = vadd.f32 %v197_v1, %v196_v0  ;;  %s201_s23 = scalar_lea.sflag [#allocation4], %s662_s30  ;;  %s449_s24 = scalar_lea.vmem %s216_s8, 32 }
  0x3e   : > { %p450_p8 = scmp.ne.s32.totalorder %s216_s8, %s449_s24  ;;  %s537_s17 = smov [#allocation7]  }
  0x3f   : > { %199 = vst [vmem:[%s195_s21] sm:$0x3] %v198_v2  ;;  %s453_s18 = sshll.u32 %s537_s17, 4  ;;  %s454_s18 = int_to_ptr.vmem [resolvable:$false] %s453_s18 }
  0x40   : > { %p451_p1 = pnand %p450_p8, %p639_p0  ;;  %s455_s27 = scalar_lea.vmem %s454_s18, 64 }
  0x41   : > { %p456_p11 = scmp.lt.s32.totalorder %s216_s8, %s454_s18  ;;  %p457_p2 = scmp.lt.s32.totalorder %s455_s27, %s449_s24 }
  0x42   : > { %p452_p13 = pneg %p451_p1 }
  0x43   : > { %p458_p12 = por %p457_p2, %p456_p11 }
  0x45   : > { %p459_p3 = pnand %p458_p12, %p452_p13 }
  0x47   : > { %462 = shalt.err (!%p459_p3)
}
  0x48   : > { %s463_s12 = scalar_lea.hbm %s213_s19, 32  ;;  %s467_s29 = scalar_lea.hbm %s716_s2, 64 }
  0x49   : > { %p464_p5 = scmp.ne.s32.totalorder %s213_s19, %s463_s12  ;;  %p468_p4 = scmp.lt.s32.totalorder %s213_s19, %s716_s2 }
  0x4a   : > { %p469_p10 = scmp.lt.s32.totalorder %s467_s29, %s463_s12 }
  0x4b   : > { %p465_p7 = pnand %p464_p5, %p639_p0 }
  0x4c   : > { %p470_p9 = por %p469_p10, %p468_p4 }
  0x4d   : > { %p466_p6 = pneg %p465_p7 }
  0x4f   : > { %p471_p8 = pnand %p470_p9, %p466_p6 }
  0x51   : > { %474 = shalt.err (!%p471_p8)
}
  0x52   : > { %328 = dma.vmem_to_hbm [thread:$0]  (%p639_p0), %s216_s8, 32, %s213_s19, %s201_s23  }
  0x53 PF: > { %s227_s6 = sand.u32 1, %s513_s9   ;;  %p727_p1 = scmp.ne.s32.totalorder %s721_s20, 0 }
  0x54   : > { %p728_p13 = scmp.ge.s32.totalorder %s533_s14, 2  ;;  %s228_s7 = scalar_lea.sflag [#allocation4], %s227_s6 }
  0x56   : > { %p339_p11 = pnand %p728_p13, %p727_p1 }
  0x58   : > { %p340_p2 = pneg %p339_p11 }
  0x5a   : > { %508 = dma.done.wait (%p340_p2), %s228_s7, 32  }
  0x5b   : > { %510 = vsyncadd (%p340_p2), %s228_s7, 4294967264  ;;  %s19_s14 = sadd.s32 1, %s533_s14   ;;  %s729_s9 = smov %s517_s10 }
  0x5c   : > { %p16_p12 = scmp.ge.s32.totalorder %s19_s14, 4   ;;  %s730_s10 = smov %s521_s11 }
  0x5d   : > { %s731_s11 = smov %s645_s5  ;;  %s732_s12 = smov %s529_s13 }
  0x5e   : > { %s733_s13 = smov %s735_s25  ;;  %18 = sbr.rel (!%p16_p12) target bundleno = 7 (0x7), region = 78 }
  0x63   :  { %233 = vsyncpa [#allocation3], 1 }
  0x64   :  { %235 = vsyncpa [#allocation3 + $0x1], 1 }
  0x65   :  { %236 = vsyncpa [#allocation6], 1 }
  0x66   :  { %237 = vsyncpa [#allocation4], 1 }
  0x67   :  { %239 = vsyncpa [#allocation4 + $0x1], 1 }

</bundles_post_ra>
